<compile_context>
chip_gen: v7x
topology: tpu7x:2x2x1
jax: 0.10.0
libtpu: 0.0.40
codegen_flags: <defaults>
</compile_context>

<pallas_src>
import functools

import jax
import jax.numpy as jnp
import numpy as np
from jax import lax
from jax.experimental import pallas as pl
from jax.experimental.pallas import tpu as pltpu


def _channel_attention_kernel(x_ref, w1_ref, w2_ref, o_ref,
                              sum_ref, max_ref, *, hw_total, t_hw, nb):
    # x_ref  : (nb, C, t_hw)  spatial tile of nb batch elements (native dtype)
    # w1_ref : (C//16, C)     fc1 weight (native PyTorch layout)
    # w2_ref : (C, C//16)     fc2 weight
    # o_ref  : (nb, C, 1)     per-element attention columns
    # sum_ref: (C, nb) f32    running spatial sum  (scratch)
    # max_ref: (C, nb) f32    running spatial max  (scratch)
    t = pl.program_id(1)
    n_t = pl.num_programs(1)

    @pl.when(t == 0)
    def _init():
        sum_ref[...] = jnp.zeros_like(sum_ref)
        max_ref[...] = jnp.full_like(max_ref, -jnp.inf)

    hw_rem = hw_total % t_hw  # static Python int

    def _accumulate(masked):
        for b in range(nb):                       # nb is small & static
            xb = x_ref[b]                         # (C, t_hw)
            if masked:
                # Only traced for the last spatial tile: valid lane count is
                # hw_rem (a compile-time constant), OOB lanes hold garbage.
                lane = lax.broadcasted_iota(jnp.int32, xb.shape, 1)
                valid = lane < hw_rem
                xs = jnp.where(valid, xb, 0)
                xm = jnp.where(valid, xb, -jnp.inf)
            else:
                xs = xb
                xm = xb
            # Accumulate sum in f32 (no whole-tile f32 materialization);
            # max in the native dtype, cast only the (C, 1) partial result.
            sum_ref[:, b:b + 1] += jnp.sum(xs, axis=1, keepdims=True,
                                           dtype=jnp.float32)
            col_max = jnp.max(xm, axis=1, keepdims=True).astype(jnp.float32)
            max_ref[:, b:b + 1] = jnp.maximum(max_ref[:, b:b + 1], col_max)

    if hw_rem == 0:
        # All tiles full: never pay for the mask.
        _accumulate(masked=False)
    else:
        # Mask only on the last (partial) spatial tile.
        @pl.when(t == n_t - 1)
        def _acc_last():
            _accumulate(masked=True)

        @pl.when(t < n_t - 1)
        def _acc_steady():
            _accumulate(masked=False)

    @pl.when(t == n_t - 1)
    def _finalize():
        avg = sum_ref[...] * (1.0 / float(hw_total))       # (C, nb) f32
        mx = max_ref[...]                                  # (C, nb) f32
        pooled = jnp.concatenate([avg, mx], axis=1)        # (C, 2*nb)

        w1 = w1_ref[...].astype(jnp.float32)               # (C//16, C)
        w2 = w2_ref[...].astype(jnp.float32)               # (C, C//16)

        # Shared MLP on both branches at once: 2 matmuls instead of 4.
        h = jnp.maximum(jnp.dot(w1, pooled,
                                preferred_element_type=jnp.float32), 0.0)
        y = jnp.dot(w2, h, preferred_element_type=jnp.float32)   # (C, 2*nb)
        att = jax.nn.sigmoid(y[:, :nb] + y[:, nb:]).astype(o_ref.dtype)

        for b in range(nb):
            o_ref[b] = att[:, b:b + 1]                     # (C, 1) column


def channel_attention(x_nchw, w1, w2, *,
                      max_tile_bytes=8 * 1024 * 1024,
                      max_batch_block=16,
                      out_pad_budget_bytes=2 * 1024 * 1024):
    """x_nchw: (N, C, H, W); w1: (C//16, C); w2: (C, C//16) -> (N, C, 1, 1)."""
    N, C, H, W = x_nchw.shape
    HW = H * W
    hidden = w1.shape[0]
    out_dtype = x_nchw.dtype

    # Free reshape (no data movement): NCHW is already (N, C, HW)-contiguous.
    x_flat = x_nchw.reshape(N, C, HW)

    itemsize = jnp.dtype(x_nchw.dtype).itemsize
    elem_bytes = C * HW * itemsize

    if elem_bytes <= max_tile_bytes:
        # Small feature map: whole (C, HW) per element, block several batch
        # elements per grid step.  t_hw == HW (full trailing dims) keeps the
        # DMA region one contiguous HBM slab and needs no masking.
        t_hw = HW
        nb = int(min(N, max_batch_block, max_tile_bytes // elem_bytes))
        # The (nb, C, 1) output block lane-pads to 128: bound that padding.
        pad_cap = out_pad_budget_bytes // (C * 128 * jnp.dtype(out_dtype).itemsize)
        nb = int(min(nb, max(1, pad_cap)))
        # Keep >= 2 parallel grid steps along the batch axis (v7x megacore).
        if N >= 2:
            nb = min(nb, N // 2)
        nb = max(nb, 1)
        # Exact division: no partial batch blocks.
        while N % nb:
            nb -= 1
    else:
        # Large feature map: one element per step, tile the spatial axis in
        # multiples of 128 lanes sized to ~max_tile_bytes.
        nb = 1
        lanes = (max_tile_bytes // (C * itemsize)) // 128 * 128
        t_hw = int(max(128, lanes))

    num_t = pl.cdiv(HW, t_hw)
    num_nb = N // nb

    kernel = functools.partial(_channel_attention_kernel,
                               hw_total=HW, t_hw=t_hw, nb=nb)

    out = pl.pallas_call(
        kernel,
        out_shape=jax.ShapeDtypeStruct((N, C, 1), out_dtype),
        grid_spec=pltpu.PrefetchScalarGridSpec(
            num_scalar_prefetch=0,
            grid=(num_nb, num_t),
            in_specs=[
                pl.BlockSpec((nb, C, t_hw), lambda i, t: (i, 0, t)),
                pl.BlockSpec((hidden, C), lambda i, t: (0, 0)),
                pl.BlockSpec((C, hidden), lambda i, t: (0, 0)),
            ],
            out_specs=pl.BlockSpec((nb, C, 1), lambda i, t: (i, 0, 0)),
            scratch_shapes=[
                pltpu.VMEM((C, nb), jnp.float32),   # running sum
                pltpu.VMEM((C, nb), jnp.float32),   # running max
            ],
        ),
        compiler_params=pltpu.CompilerParams(
            dimension_semantics=("parallel", "arbitrary"),
            vmem_limit_bytes=32 * 1024 * 1024,
        ),
    )(x_flat, w1, w2)

    return out.reshape(N, C, 1, 1)


def _reference(x_nchw, w1, w2):
    """Pure-JAX reference matching the PyTorch forward."""
    avg = jnp.mean(x_nchw, axis=(2, 3))          # (N, C)
    mx = jnp.max(x_nchw, axis=(2, 3))            # (N, C)

    def mlp(v):
        h = jnp.maximum(v @ w1.T, 0.0)           # (N, C//16)
        return h @ w2.T                          # (N, C)

    out = jax.nn.sigmoid(mlp(avg) + mlp(mx))     # (N, C)
    return out.reshape(*out.shape, 1, 1)


if __name__ == "__main__":
    # Small shapes consistent with the module: C must be divisible by 16.
    N, C, H, W = 2, 64, 16, 16
    hidden = C // 16

    key = jax.random.PRNGKey(0)
    kx, k1, k2 = jax.random.split(key, 3)

    x = jax.random.normal(kx, (N, C, H, W), dtype=jnp.float32)

    # Deterministic synthetic weights (Conv2d 1x1, no bias -> dense matrices).
    w1 = jax.random.uniform(k1, (hidden, C), dtype=jnp.float32,
                            minval=-1.0, maxval=1.0) * (1.0 / np.sqrt(C))
    w2 = jax.random.uniform(k2, (C, hidden), dtype=jnp.float32,
                            minval=-1.0, maxval=1.0) * (1.0 / np.sqrt(hidden))

    # Test 1: default path (whole map per step, nb = 1, single tile).
    out = jax.block_until_ready(channel_attention(x, w1, w2))
    ref = jax.block_until_ready(_reference(x, w1, w2))
    assert out.shape == (N, C, 1, 1), out.shape
    np.testing.assert_allclose(np.asarray(out), np.asarray(ref),
                               rtol=1e-5, atol=1e-5)

    # Test 2: force the tiled spatial-reduction path (HW = 400, tile = 128 ->
    # 4 tiles, last partial) to exercise the accumulators + last-tile masking.
    x2 = jax.random.normal(jax.random.PRNGKey(1), (N, C, 20, 20),
                           dtype=jnp.float32)
    out2 = jax.block_until_ready(
        channel_attention(x2, w1, w2, max_tile_bytes=C * 128 * 4))
    ref2 = jax.block_until_ready(_reference(x2, w1, w2))
    np.testing.assert_allclose(np.asarray(out2), np.asarray(ref2),
                               rtol=1e-5, atol=1e-5)

    # Test 3: small-feature-map batch-blocking path (7x7, N=4 -> nb=2 per
    # grid step, t_hw = 49 full extent, batched (C, 2*nb) MLP epilogue).
    x3 = jax.random.normal(jax.random.PRNGKey(2), (4, C, 7, 7),
                           dtype=jnp.float32)
    out3 = jax.block_until_ready(channel_attention(x3, w1, w2))
    ref3 = jax.block_until_ready(_reference(x3, w1, w2))
    np.testing.assert_allclose(np.asarray(out3), np.asarray(ref3),
                               rtol=1e-5, atol=1e-5)

    print("KERNEL_OK")
</pallas_src>

<mosaic_0001>
module attributes {stable_mosaic.version = 11 : i64} {
  func.func @_channel_attention_kernel(%arg0: i32, %arg1: i32, %arg2: memref<1x64x256xf32, #tpu.memory_space<vmem>>, %arg3: memref<4x64xf32, #tpu.memory_space<vmem>>, %arg4: memref<64x4xf32, #tpu.memory_space<vmem>>, %arg5: memref<1x64x1xf32, #tpu.memory_space<vmem>>, %arg6: memref<64x1xf32, #tpu.memory_space<vmem>>, %arg7: memref<64x1xf32, #tpu.memory_space<vmem>>) attributes {dimension_semantics = [#tpu.dimension_semantics<parallel>, #tpu.dimension_semantics<arbitrary>], iteration_bounds = array<i64: 2, 1>, scalar_prefetch = 0 : i64, scratch_operands = 2 : i64, tpu.core_type = #tpu.core_type<tc>, window_params = [{transform_indices = @transform_0, window_bounds = array<i64: 1, 64, 256>}, {pipeline_mode = #tpu.pipeline_mode<synchronous>, transform_indices = @transform_1, window_bounds = array<i64: 4, 64>}, {pipeline_mode = #tpu.pipeline_mode<synchronous>, transform_indices = @transform_2, window_bounds = array<i64: 64, 4>}, {transform_indices = @transform_3, window_bounds = array<i64: 1, 64, 1>}]} {
    %c0_i32 = arith.constant 0 : i32
    %0 = arith.cmpi eq, %arg1, %c0_i32 : i32
    %1 = arith.extui %0 : i1 to i32
    %c0_i32_0 = arith.constant 0 : i32
    %2 = arith.cmpi ne, %1, %c0_i32_0 : i32
    scf.if %2 {
      %cst_14 = arith.constant 0.000000e+00 : f32
      %18 = vector.broadcast %cst_14 : f32 to vector<64x1xf32>
      %c0_15 = arith.constant 0 : index
      %c0_16 = arith.constant 0 : index
      %19 = vector.load %arg6[%c0_15, %c0_16] : memref<64x1xf32, #tpu.memory_space<vmem>>, vector<64x1xf32>
      tpu.vector_store %arg6[%c0_15, %c0_16], %18 {strides = array<i32>} : memref<64x1xf32, #tpu.memory_space<vmem>>, vector<64x1xf32>,
      %cst_17 = arith.constant 0xFF800000 : f32
      %20 = vector.broadcast %cst_17 : f32 to vector<64x1xf32>
      %c0_18 = arith.constant 0 : index
      %c0_19 = arith.constant 0 : index
      %21 = vector.load %arg7[%c0_18, %c0_19] : memref<64x1xf32, #tpu.memory_space<vmem>>, vector<64x1xf32>
      tpu.vector_store %arg7[%c0_18, %c0_19], %20 {strides = array<i32>} : memref<64x1xf32, #tpu.memory_space<vmem>>, vector<64x1xf32>,
    } else {
    }
    %c0 = arith.constant 0 : index
    %c0_1 = arith.constant 0 : index
    %c0_2 = arith.constant 0 : index
    %3 = vector.load %arg2[%c0, %c0_1, %c0_2] : memref<1x64x256xf32, #tpu.memory_space<vmem>>, vector<1x64x256xf32>
    %4 = vector.shape_cast %3 : vector<1x64x256xf32> to vector<64x256xf32>
    %c0_3 = arith.constant 0 : index
    %c0_4 = arith.constant 0 : index
    %5 = vector.load %arg6[%c0_3, %c0_4] : memref<64x1xf32, #tpu.memory_space<vmem>>, vector<64x1xf32>
    %cst = arith.constant dense<0.000000e+00> : vector<64xf32>
    %6 = vector.multi_reduction <add>, %4, %cst [1] : vector<64x256xf32> to vector<64xf32>
    %7 = vector.shape_cast %6 : vector<64xf32> to vector<64x1xf32>
    %8 = arith.addf %5, %7 : vector<64x1xf32>
    %c0_5 = arith.constant 0 : index
    %c0_6 = arith.constant 0 : index
    %9 = vector.load %arg6[%c0_5, %c0_6] : memref<64x1xf32, #tpu.memory_space<vmem>>, vector<64x1xf32>
    tpu.vector_store %arg6[%c0_5, %c0_6], %8 {strides = array<i32>} : memref<64x1xf32, #tpu.memory_space<vmem>>, vector<64x1xf32>,
    %cst_7 = arith.constant dense<0xFF800000> : vector<64xf32>
    %10 = vector.multi_reduction <maximumf>, %4, %cst_7 [1] : vector<64x256xf32> to vector<64xf32>
    %11 = vector.shape_cast %10 : vector<64xf32> to vector<64x1xf32>
    %c0_8 = arith.constant 0 : index
    %c0_9 = arith.constant 0 : index
    %12 = vector.load %arg7[%c0_8, %c0_9] : memref<64x1xf32, #tpu.memory_space<vmem>>, vector<64x1xf32>
    %13 = arith.maximumf %12, %11 : vector<64x1xf32>
    %c0_10 = arith.constant 0 : index
    %c0_11 = arith.constant 0 : index
    %14 = vector.load %arg7[%c0_10, %c0_11] : memref<64x1xf32, #tpu.memory_space<vmem>>, vector<64x1xf32>
    tpu.vector_store %arg7[%c0_10, %c0_11], %13 {strides = array<i32>} : memref<64x1xf32, #tpu.memory_space<vmem>>, vector<64x1xf32>,
    %c0_i32_12 = arith.constant 0 : i32
    %15 = arith.cmpi eq, %arg1, %c0_i32_12 : i32
    %16 = arith.extui %15 : i1 to i32
    %c0_i32_13 = arith.constant 0 : i32
    %17 = arith.cmpi ne, %16, %c0_i32_13 : i32
    scf.if %17 {
      %c0_14 = arith.constant 0 : index
      %c0_15 = arith.constant 0 : index
      %18 = vector.load %arg6[%c0_14, %c0_15] : memref<64x1xf32, #tpu.memory_space<vmem>>, vector<64x1xf32>
      %cst_16 = arith.constant 3.906250e-03 : f32
      %19 = vector.broadcast %cst_16 : f32 to vector<64x1xf32>
      %20 = arith.mulf %18, %19 : vector<64x1xf32>
      %c0_17 = arith.constant 0 : index
      %c0_18 = arith.constant 0 : index
      %21 = vector.load %arg7[%c0_17, %c0_18] : memref<64x1xf32, #tpu.memory_space<vmem>>, vector<64x1xf32>
      %22 = tpu.concatenate %20, %21 in 1 : vector<64x1xf32>, vector<64x1xf32> -> vector<64x2xf32>
      %c0_19 = arith.constant 0 : index
      %c0_20 = arith.constant 0 : index
      %23 = vector.load %arg3[%c0_19, %c0_20] : memref<4x64xf32, #tpu.memory_space<vmem>>, vector<4x64xf32>
      %c0_21 = arith.constant 0 : index
      %c0_22 = arith.constant 0 : index
      %24 = vector.load %arg4[%c0_21, %c0_22] : memref<64x4xf32, #tpu.memory_space<vmem>>, vector<64x4xf32>
      %cst_23 = arith.constant dense<0.000000e+00> : vector<4x2xf32>
      %25 = tpu.matmul %23, %22, %cst_23 {dimension_numbers = #tpu.dot_dimension_numbers<[1], [0], [0], [1], [0, 0, 1, 1], [], []>} : vector<4x64xf32>, vector<64x2xf32>, vector<4x2xf32> -> vector<4x2xf32>
      %cst_24 = arith.constant 0.000000e+00 : f32
      %26 = vector.broadcast %cst_24 : f32 to vector<4x2xf32>
      %27 = arith.maximumf %25, %26 : vector<4x2xf32>
      %cst_25 = arith.constant dense<0.000000e+00> : vector<64x2xf32>
      %28 = tpu.matmul %24, %27, %cst_25 {dimension_numbers = #tpu.dot_dimension_numbers<[1], [0], [0], [1], [0, 0, 1, 1], [], []>} : vector<64x4xf32>, vector<4x2xf32>, vector<64x2xf32> -> vector<64x2xf32>
      %29 = vector.extract_strided_slice %28 {offsets = [0, 0], sizes = [64, 1], strides = [1, 1]} : vector<64x2xf32> to vector<64x1xf32>
      %30 = vector.extract_strided_slice %28 {offsets = [0, 1], sizes = [64, 1], strides = [1, 1]} : vector<64x2xf32> to vector<64x1xf32>
      %31 = arith.addf %29, %30 : vector<64x1xf32>
      %32 = arith.negf %31 : vector<64x1xf32>
      %33 = math.exp %32 : vector<64x1xf32>
      %cst_26 = arith.constant 1.000000e+00 : f32
      %34 = vector.broadcast %cst_26 : f32 to vector<64x1xf32>
      %35 = arith.addf %34, %33 : vector<64x1xf32>
      %36 = arith.divf %34, %35 : vector<64x1xf32>
      %c0_27 = arith.constant 0 : index
      %c0_28 = arith.constant 0 : index
      %c0_29 = arith.constant 0 : index
      %37 = vector.load %arg5[%c0_27, %c0_28, %c0_29] : memref<1x64x1xf32, #tpu.memory_space<vmem>>, vector<1x64x1xf32>
      %38 = vector.shape_cast %37 : vector<1x64x1xf32> to vector<64x1xf32>
      %39 = vector.shape_cast %36 : vector<64x1xf32> to vector<1x64x1xf32>
      tpu.vector_store %arg5[%c0_27, %c0_28, %c0_29], %39 {strides = array<i32>} : memref<1x64x1xf32, #tpu.memory_space<vmem>>, vector<1x64x1xf32>,
    } else {
    }
    return
  }
  func.func @transform_0(%arg0: i32, %arg1: i32) -> (i32, i32, i32) {
    %c0_i32 = arith.constant 0 : i32
    %c0_i32_0 = arith.constant 0 : i32
    return %arg0, %c0_i32, %arg1 : i32, i32, i32
  }
  func.func @transform_1(%arg0: i32, %arg1: i32) -> (i32, i32) {
    %c0_i32 = arith.constant 0 : i32
    %c0_i32_0 = arith.constant 0 : i32
    %c0_i32_1 = arith.constant 0 : i32
    return %c0_i32, %c0_i32_0 : i32, i32
  }
  func.func @transform_2(%arg0: i32, %arg1: i32) -> (i32, i32) {
    %c0_i32 = arith.constant 0 : i32
    %c0_i32_0 = arith.constant 0 : i32
    %c0_i32_1 = arith.constant 0 : i32
    return %c0_i32, %c0_i32_0 : i32, i32
  }
  func.func @transform_3(%arg0: i32, %arg1: i32) -> (i32, i32, i32) {
    %c0_i32 = arith.constant 0 : i32
    %c0_i32_0 = arith.constant 0 : i32
    %c0_i32_1 = arith.constant 0 : i32
    return %arg0, %c0_i32, %c0_i32_0 : i32, i32, i32
  }
}

</mosaic_0001>

<bundles_post_ra>
// kernel: tpu_custom_call.1
= control target key start
LH: loop header
LB: loop body
LE: loop exit
PB: predicated region body
PF: predicated region fallthrough
CT: control target
= control target key end

     0   :  { %8 = vsyncpa [#allocation5], 0  ;;  %s1361_s0 = inlined_call_operand.hbm [shape: f32[2,64,256], index: 0, kind: input, shape index: {}]   ;;  %s1362_s1 = inlined_call_operand.vmem [shape: f32[4,64], index: 1, kind: input, shape index: {}]   ;;  %s1363_s2 = inlined_call_operand.vmem [shape: f32[64,4], index: 2, kind: input, shape index: {}]   ;;  %s1364_s3 = inlined_call_operand.vmem [shape: f32[2,64,1], index: 3, kind: output, shape index: {}]  }
   0x1   :  { %10 = vsyncpa [#allocation5 + $0x1], 0  ;;  %s1123_s12 = smov 0   ;;  %s1125_s13 = smov 0  }
   0x2   :  { %s1127_s14 = smov 0   ;;  %s1129_s15 = smov 0  }
   0x3   :  { %s1131_s16 = smov 0   ;;  %s1133_s17 = smov 0  }
   0x4 LB: > { %s801_s18 = sadd.s32 4294967295, %s1092_s17   ;;  %s28_s19 = sadd.s32 1, %s1088_s16  ;;  %s1092_s17 = sphi %s1133_s17, %s16_s17   ;;  %s1088_s16 = sphi %s1131_s16, %s1372_s16   ;;  %s1084_s15 = sphi %s1129_s15, %s1371_s15   ;;  %s1080_s14 = sphi %s1127_s14, %s1370_s14   ;;  %s1076_s13 = sphi %s1125_s13, %s1369_s13   ;;  %s1072_s12 = sphi %s1123_s12, %s1368_s12  }
   0x5   : > { %p30_p0 = scmp.ge.s32.totalorder %s28_s19, 2  ;;  %s37_s20 = sadd.s32 1, %s1080_s14 }
   0x6   : > { %p44_p1 = scmp.ne.s32.totalorder %s1080_s14, %s1076_s13  ;;  %p45_p2 = scmp.eq.s32.totalorder %s1092_s17, 0 }
   0x7   : > { %s1374_s19 = smov (%p30_p0, %s28_s19), 0  ;;  %p50_p4 = scmp.ne.s32.totalorder %s1076_s13, %s1072_s12 }
   0x8   : > { %p1159_p3 = por %p45_p2, %p44_p1  ;;  %s32_s22 = ssub.s32 %s1088_s16, %s1374_s19 }
   0x9   : > { %p51_p5 = scmp.eq.s32.totalorder %s801_s18, 0  ;;  %p35_p6 = scmp.eq.s32.totalorder %s32_s22, 0 }
   0xa   : > { %p903_p8 = scmp.lt.s32.totalorder %s1092_s17, 2  ;;  %s148_s25 = sand.u32 1, %s1080_s14  }
   0xb   : > { %p1166_p7 = por %p51_p5, %p50_p4  ;;  %s832_s26 = sshll.u32 %s1088_s16, 11 }
   0xc   : > { %s1172_s24 = scalar_select %p35_p6, %s1080_s14, %s37_s20  }
   0xd   : > { %s805_s27 = sshll.u32 %s148_s25, 7  ;;  %s1179_s30 = scalar_lea.hbm %s1361_s0, %s832_s26 }
   0xe   : > { %s152_s4 = scalar_lea.vmem [#allocation4], %s805_s27  ;;  %p1183_p9 = pnand %p903_p8, %p1159_p3 }
   0xf   : > { %s161_s5 = sshll.u32 %s152_s4, 4  ;;  %s1189_s7 = scalar_lea.sflag [#allocation5], %s148_s25  ;;  %s1187_s5 = int_to_ptr.vmem [resolvable:$true] %s161_s5 }
  0x10   : > { %s1012_s8 = scalar_lea.hbm %s1179_s30, 2048  ;;  %p1014_p11 = pneg %p1183_p9 }
  0x11   : > { %p1013_p10 = scmp.ne.s32.totalorder %s1179_s30, %s1012_s8  ;;  %s1017_s11 = scalar_lea.hbm %s1361_s0, 4096 }
  0x12   : > { %p1018_p0 = scmp.lt.u32.totalorder %s1179_s30, %s1361_s0  ;;  %p1019_p1 = scmp.lt.u32.totalorder %s1017_s11, %s1012_s8 }
  0x13   : > { %p1015_p12 = pnand %p1014_p11, %p1013_p10  ;;  %p1021_p3 = scmp.lt.u32.totalorder %s1012_s8, %s1179_s30 }
  0x14   : > { %p1020_p2 = por %p1019_p1, %p1018_p0 }
  0x15   : > { %p1016_p13 = pneg %p1015_p12 }
  0x16   : > { %p1022_p4 = por %p1021_p3, %p1020_p2 }
  0x18   : > { %p1023_p5 = pnand %p1022_p4, %p1016_p13 }
  0x1a   : > { %1026 = shalt.err (!%p1023_p5)
}
  0x1b   : > { %s1027_s20 = scalar_lea.vmem %s1187_s5, 2048  ;;  %s1094_s21 = smov [#allocation4]  }
  0x1c   : > { %p1028_p6 = scmp.ne.s32.totalorder %s1187_s5, %s1027_s20  ;;  %s1032_s22 = sshll.u32 %s1094_s21, 4  ;;  %s1033_s22 = int_to_ptr.vmem [resolvable:$false] %s1032_s22 }
  0x1d   : > { %s1034_s25 = scalar_lea.vmem %s1033_s22, 4096  ;;  %p1035_p12 = scmp.lt.s32.totalorder %s1187_s5, %s1033_s22 }
  0x1e   : > { %p1030_p8 = pnand %p1028_p6, %p1014_p11  ;;  %p1036_p0 = scmp.lt.s32.totalorder %s1034_s25, %s1027_s20 }
  0x20   : > { %p1031_p10 = pneg %p1030_p8  ;;  %p1037_p1 = por %p1036_p0, %p1035_p12 }
  0x22   : > { %p1038_p2 = pnand %p1037_p1, %p1031_p10 }
  0x24   : > { %1041 = shalt.err (!%p1038_p2)
}
  0x25   : > { %s1095_s26 = smov 256   ;;  %s1096_s27 = smov 16  }
  0x26   : > { %902 = dma.hbm_to_vmem [thread:$0]  (!%p1183_p9), %s1179_s30, 2048, %s1187_s5, %s1189_s7, %s1095_s26, %s1095_s26, %s1096_s27  }
  0x27   : > { %p808_p11 = scmp.ge.s32.totalorder %s1092_s17, 1  ;;  %p169_p13 = scmp.lt.s32.totalorder %s1092_s17, 3 }
  0x29   : > { %p170_p3 = pnand %p808_p11, %p169_p13 }
  0x2a   : > { %s175_s28 = sand.u32 (!%p170_p3), 1, %s1076_s13  }
  0x2b   : > { %173 = sbr.rel (%p170_p3) target bundleno = 935 (0x3a7), region = 32  ;;  %s809_s29 = sshll.u32 (!%p170_p3), %s175_s28, 7 }
  0x2c   : > { %s176_s4 = scalar_lea.sflag (!%p170_p3), [#allocation5], %s175_s28  ;;  %s1220_s8 = scalar_lea.vmem (!%p170_p3), [#allocation4], %s809_s29 }
  0x32   : > { %1067 = dma.done.wait (%p1166_p7), %s176_s4, 2048  }
  0x33   : > { %1069 = vsyncadd (%p1166_p7), %s176_s4, 4294965248  ;;  %vm212_vm0 = vcmask 7168   ;;  %v1097_v0 = vmov -inf   ;;  %v233_v1 = vld [vmem:[%s1220_s8 + $0x20] sm:$0xff]  ;;  %v234_v2 = vld [vmem:[%s1220_s8 + $0x28] sm:$0xff]  ;;  %v1098_v33 = vmov 0.0  }
  0x34   : > { %223 = vst.msk [vmem:[#allocation3 + $0x10] sm:$0xff] %vm212_vm0, %v1097_v0  ;;  %221 = vst.msk [vmem:[#allocation3] sm:$0xff] %vm212_vm0, %v1097_v0  ;;  %v229_v3 = vld [vmem:[%s1220_s8] sm:$0xff]  ;;  %v300_v4 = vmax.f32 %v233_v1, %v234_v2  ;;  %v230_v5 = vld [vmem:[%s1220_s8 + $0x8] sm:$0xff]  ;;  %v259_v28 = vadd.f32 %v234_v2, %v233_v1  ;;  %v1099_v51 = vmov 0.0|0.0   ;;  %s1100_s23 = smov 1  }
  0x35   : > { %222 = vst.msk [vmem:[#allocation3 + $0x8] sm:$0xff] %vm212_vm0, %v1097_v0  ;;  %224 = vst.msk [vmem:[#allocation3 + $0x18] sm:$0xff] %vm212_vm0, %v1097_v0  ;;  %v235_v6 = vld [vmem:[%s1220_s8 + $0x30] sm:$0xff]  ;;  %v236_v7 = vld [vmem:[%s1220_s8 + $0x38] sm:$0xff]  ;;  %v294_v8 = vmax.f32 %v229_v3, %v230_v5  ;;  %v253_v26 = vadd.f32 %v230_v5, %v229_v3  ;;  %885 = vmatprep.subr.bf16.mxu0 %v1099_v51  ;;  %vm1101_vm1 = vmmov 0   ;;  %vm418_vm2 = vcmask 523264  }
  0x36   : > { %225 = vst.msk [vmem:[#allocation3 + $0x20] sm:$0xff] %vm212_vm0, %v1097_v0  ;;  %226 = vst.msk [vmem:[#allocation3 + $0x28] sm:$0xff] %vm212_vm0, %v1097_v0  ;;  %v231_v9 = vld [vmem:[%s1220_s8 + $0x10] sm:$0xff]  ;;  %v232_v10 = vld [vmem:[%s1220_s8 + $0x18] sm:$0xff]  ;;  %301 = vmax.xlane.f32.xlu1 %v300_v4  ;;  %v303_v11 = vmax.f32 %v235_v6, %v236_v7  ;;  %v262_v27 = vadd.f32 %v236_v7, %v235_v6  ;;  %868 = vmatprep.mubr.msk.f32.mxu0 %vm1101_vm1, %v1098_v33  ;;  %vm493_vm3 = vcmask 31744   ;;  %vm518_vm4 = vcmask 1043456  }
  0x37   : > { %227 = vst.msk [vmem:[#allocation3 + $0x30] sm:$0xff] %vm212_vm0, %v1097_v0  ;;  %228 = vst.msk [vmem:[#allocation3 + $0x38] sm:$0xff] %vm212_vm0, %v1097_v0  ;;  %295 = vmax.xlane.f32.xlu0 %v294_v8  ;;  %v297_v12 = vmax.f32 %v231_v9, %v232_v10  ;;  %v239_v13 = vld [vmem:[%s1220_s8 + $0x50] sm:$0xff]  ;;  %v240_v14 = vld [vmem:[%s1220_s8 + $0x58] sm:$0xff]  ;;  %v256_v25 = vadd.f32 %v232_v10, %v231_v9  ;;  %p203_p7 = scmp.lt.s32.totalorder %s1084_s15, 1 }
  0x38   : > { %v237_v15 = vld [vmem:[%s1220_s8 + $0x40] sm:$0xff]  ;;  %v238_v16 = vld [vmem:[%s1220_s8 + $0x48] sm:$0xff]  ;;  %v309_v17 = vmax.f32 %v239_v13, %v240_v14  ;;  %v243_v19 = vld [vmem:[%s1220_s8 + $0x70] sm:$0xff]  ;;  %v268_v29 = vadd.f32 %v240_v14, %v239_v13  ;;  %214 = vst.msk [vmem:[#allocation2 + $0x8] sm:$0xff] %vm212_vm0, %v1098_v33 }
  0x39   : > { %v306_v18 = vmax.f32 %v237_v15, %v238_v16  ;;  %v244_v20 = vld [vmem:[%s1220_s8 + $0x78] sm:$0xff]  ;;  %v241_v21 = vld [vmem:[%s1220_s8 + $0x60] sm:$0xff]  ;;  %v242_v22 = vld [vmem:[%s1220_s8 + $0x68] sm:$0xff]  ;;  %v265_v30 = vadd.f32 %v238_v16, %v237_v15  ;;  %213 = vst.msk [vmem:[#allocation2] sm:$0xff] %vm212_vm0, %v1098_v33  ;;  %s1102_s8 = smov 127   ;;  %s1376_s15 = smov (!%p203_p7, %s1084_s15), 1 }
  0x3a   : > { %304 = vmax.xlane.f32.xlu1 %v303_v11  ;;  %v315_v23 = vmax.f32 %v243_v19, %v244_v20  ;;  %v312_v24 = vmax.f32 %v241_v21, %v242_v22  ;;  %v274_v31 = vadd.f32 %v244_v20, %v243_v19  ;;  %v271_v32 = vadd.f32 %v242_v22, %v241_v21 }
  0x3b   : > { %298 = vmax.xlane.f32.xlu0 %v297_v12  ;;  %215 = vst.msk [vmem:[#allocation2 + $0x10] sm:$0xff] %vm212_vm0, %v1098_v33  ;;  %216 = vst.msk [vmem:[#allocation2 + $0x18] sm:$0xff] %vm212_vm0, %v1098_v33  ;;  %v320_v34 = vld [vmem:[#allocation3 + $0x10] sm:$0xff]  ;;  %v318_v35 = vld [vmem:[#allocation3] sm:$0xff] }
  0x3c   : > { %217 = vst.msk [vmem:[#allocation2 + $0x20] sm:$0xff] %vm212_vm0, %v1098_v33  ;;  %218 = vst.msk [vmem:[#allocation2 + $0x28] sm:$0xff] %vm212_vm0, %v1098_v33  ;;  %v321_v40 = vld [vmem:[#allocation3 + $0x18] sm:$0xff]  ;;  %v319_v41 = vld [vmem:[#allocation3 + $0x8] sm:$0xff] }
  0x3d   : > { %219 = vst.msk [vmem:[#allocation2 + $0x30] sm:$0xff] %vm212_vm0, %v1098_v33  ;;  %220 = vst.msk [vmem:[#allocation2 + $0x38] sm:$0xff] %vm212_vm0, %v1098_v33  ;;  %v323_v46 = vld [vmem:[#allocation3 + $0x28] sm:$0xff]  ;;  %v322_v47 = vld [vmem:[#allocation3 + $0x20] sm:$0xff] }
  0x3e   : > { %310 = vmax.xlane.f32.xlu1 %v309_v17  ;;  %v325_v53 = vld [vmem:[#allocation3 + $0x38] sm:$0xff]  ;;  %v324_v54 = vld [vmem:[#allocation3 + $0x30] sm:$0xff] }
  0x3f   : > { %307 = vmax.xlane.f32.xlu0 %v306_v18  ;;  %v246_v61 = vld [vmem:[#allocation2 + $0x8] sm:$0xff] }
  0x40   : > { %v245_v1 = vld [vmem:[#allocation2] sm:$0xff] }
  0x42   : > { %316 = vmax.xlane.f32.xlu1 %v315_v23  ;;  %v248_v8 = vld [vmem:[#allocation2 + $0x18] sm:$0xff]  ;;  %v247_v10 = vld [vmem:[#allocation2 + $0x10] sm:$0xff] }
  0x43   : > { %313 = vmax.xlane.f32.xlu0 %v312_v24  ;;  %v250_v17 = vld [vmem:[#allocation2 + $0x28] sm:$0xff]  ;;  %v249_v19 = vld [vmem:[#allocation2 + $0x20] sm:$0xff] }
  0x46   : > { %257 = vadd.xlane.f32.xlu1 %v256_v25  ;;  %v252_v25 = vld [vmem:[#allocation2 + $0x38] sm:$0xff] }
  0x47   : > { %254 = vadd.xlane.f32.xlu0 %v253_v26  ;;  %v251_v26 = vld [vmem:[#allocation2 + $0x30] sm:$0xff] }
  0x4a   : > { %263 = vadd.xlane.f32.xlu1 %v262_v27 }
  0x4b   : > { %260 = vadd.xlane.f32.xlu0 %v259_v28 }
  0x4e   : > { %269 = vadd.xlane.f32.xlu1 %v268_v29 }
  0x4f   : > { %266 = vadd.xlane.f32.xlu0 %v265_v30 }
  0x52   : > { %275 = vadd.xlane.f32.xlu1 %v274_v31 }
  0x53   : > { %272 = vadd.xlane.f32.xlu0 %v271_v32 }
  0xc3   : > { %v302_v36 = vpop.xlane.xlu1 %301 }
  0xc4   : > { %v328_v37 = vmax.f32 %v320_v34, %v302_v36  ;;  %v296_v38 = vpop.xlane.xlu0 %295 }
  0xc5   : > { %v326_v39 = vmax.f32 %v318_v35, %v296_v38 }
  0xc6   : > { %336 = vst.msk [vmem:[#allocation3 + $0x10] sm:$0xff] %vm212_vm0, %v328_v37 }
  0xc7   : > { %334 = vst.msk [vmem:[#allocation3] sm:$0xff] %vm212_vm0, %v326_v39  ;;  %v305_v42 = vpop.xlane.xlu1 %304 }
  0xc8   : > { %v329_v43 = vmax.f32 %v321_v40, %v305_v42  ;;  %v299_v44 = vpop.xlane.xlu0 %298 }
  0xc9   : > { %v327_v45 = vmax.f32 %v319_v41, %v299_v44 }
  0xca   : > { %337 = vst.msk [vmem:[#allocation3 + $0x18] sm:$0xff] %vm212_vm0, %v329_v43 }
  0xcb   : > { %335 = vst.msk [vmem:[#allocation3 + $0x8] sm:$0xff] %vm212_vm0, %v327_v45  ;;  %v311_v48 = vpop.xlane.xlu1 %310 }
  0xcc   : > { %v331_v49 = vmax.f32 %v323_v46, %v311_v48  ;;  %v308_v50 = vpop.xlane.xlu0 %307 }
  0xcd   : > { %v330_v52 = vmax.f32 %v322_v47, %v308_v50  ;;  %v363_v56 = vld [vmem:[#allocation3 + $0x10] sm:$0xff] }
  0xce   : > { %339 = vst.msk [vmem:[#allocation3 + $0x28] sm:$0xff] %vm212_vm0, %v331_v49  ;;  %v361_v63 = vld [vmem:[#allocation3] sm:$0xff] }
  0xcf   : > { %338 = vst.msk [vmem:[#allocation3 + $0x20] sm:$0xff] %vm212_vm0, %v330_v52  ;;  %v317_v55 = vpop.xlane.xlu1 %316 }
  0xd0   : > { %v333_v57 = vmax.f32 %v325_v53, %v317_v55  ;;  %v314_v58 = vpop.xlane.xlu0 %313 }
  0xd1   : > { %v332_v59 = vmax.f32 %v324_v54, %v314_v58  ;;  %v364_v60 = vld [vmem:[#allocation3 + $0x18] sm:$0xff] }
  0xd2   : > { %341 = vst.msk [vmem:[#allocation3 + $0x38] sm:$0xff] %vm212_vm0, %v333_v57  ;;  %v965_v62 = vpack.i.bf16 %v364_v60, %v363_v56  ;;  %v362_v0 = vld [vmem:[#allocation3 + $0x8] sm:$0xff] }
  0xd3   : > { %340 = vst.msk [vmem:[#allocation3 + $0x30] sm:$0xff] %vm212_vm0, %v332_v59  ;;  %v960_v2 = vpack.i.bf16 %v362_v0, %v361_v63  ;;  %v258_v3 = vpop.xlane.xlu1 %257 }
  0xd4   : > { %966 = vrot.lane.b32.xlu1 %v965_v62, %s1100_s23  ;;  %v278_v4 = vadd.f32 %v258_v3, %v246_v61  ;;  %v255_v5 = vpop.xlane.xlu0 %254 }
  0xd5   : > { %961 = vrot.lane.b32.xlu0 %v960_v2, %s1100_s23  ;;  %v366_v6 = vld [vmem:[#allocation3 + $0x28] sm:$0xff]  ;;  %v277_v7 = vadd.f32 %v255_v5, %v245_v1 }
  0xd6   : > { %v365_v9 = vld [vmem:[#allocation3 + $0x20] sm:$0xff]  ;;  %287 = vst.msk [vmem:[#allocation2 + $0x8] sm:$0xff] %vm212_vm0, %v278_v4 }
  0xd7   : > { %v970_v11 = vpack.i.bf16 %v366_v6, %v365_v9  ;;  %286 = vst.msk [vmem:[#allocation2] sm:$0xff] %vm212_vm0, %v277_v7  ;;  %v264_v12 = vpop.xlane.xlu1 %263  ;;  %v410_v9 = vld [vmem:[%s1363_s2] sm:$0xff] }
  0xd8   : > { %v280_v13 = vadd.f32 %v264_v12, %v248_v8  ;;  %v261_v14 = vpop.xlane.xlu0 %260  ;;  %v409_v8 = vld [vmem:[%s1362_s1] sm:$0xf]  ;;  %873 = vmatprep.mubr.msk.f32.mxu1 %vm493_vm3, %v410_v9 }
  0xd9   : > { %971 = vrot.lane.b32.xlu1 %v970_v11, %s1100_s23  ;;  %v368_v15 = vld [vmem:[#allocation3 + $0x38] sm:$0xff]  ;;  %v279_v16 = vadd.f32 %v261_v14, %v247_v10 }
  0xda   : > { %v367_v18 = vld [vmem:[#allocation3 + $0x30] sm:$0xff]  ;;  %289 = vst.msk [vmem:[#allocation2 + $0x18] sm:$0xff] %vm212_vm0, %v280_v13  ;;  %v413_v14 = vld [vmem:[%s1363_s2 + $0x18] sm:$0xff] }
  0xdb   : > { %v975_v20 = vpack.i.bf16 %v368_v15, %v367_v18  ;;  %288 = vst.msk [vmem:[#allocation2 + $0x10] sm:$0xff] %vm212_vm0, %v279_v16  ;;  %v270_v21 = vpop.xlane.xlu1 %269  ;;  %v412_v13 = vld [vmem:[%s1363_s2 + $0x10] sm:$0xff]  ;;  %v414_v15 = vld [vmem:[%s1363_s2 + $0x20] sm:$0xff]  ;;  %v415_v16 = vld [vmem:[%s1363_s2 + $0x28] sm:$0xff] }
  0xdc   : > { %v282_v22 = vadd.f32 %v270_v21, %v250_v17  ;;  %v267_v23 = vpop.xlane.xlu0 %266  ;;  %v416_v17 = vld [vmem:[%s1363_s2 + $0x30] sm:$0xff]  ;;  %v417_v18 = vld [vmem:[%s1363_s2 + $0x38] sm:$0xff] }
  0xdd   : > { %976 = vrot.lane.b32.xlu1 %v975_v20, %s1100_s23  ;;  %v281_v24 = vadd.f32 %v267_v23, %v249_v19  ;;  %v346_v32 = vld [vmem:[#allocation2 + $0x8] sm:$0xff]  ;;  %s833_s23 = sshll.u32 %s1376_s15, 6 }
  0xde   : > { %291 = vst.msk [vmem:[#allocation2 + $0x28] sm:$0xff] %vm212_vm0, %v282_v22  ;;  %v345_v31 = vld [vmem:[#allocation2] sm:$0xff]  ;;  %v354_v37 = vmul.f32 0.00390625, %v346_v32  ;;  %s207_s6 = scalar_lea.vmem %s1364_s3, %s833_s23 }
  0xdf   : > { %290 = vst.msk [vmem:[#allocation2 + $0x20] sm:$0xff] %vm212_vm0, %v281_v24  ;;  %v276_v27 = vpop.xlane.xlu1 %275  ;;  %v353_v36 = vmul.f32 0.00390625, %v345_v31 }
  0xe0   : > { %v284_v28 = vadd.f32 %v276_v27, %v252_v25  ;;  %v273_v29 = vpop.xlane.xlu0 %272 }
  0xe1   : > { %v283_v30 = vadd.f32 %v273_v29, %v251_v26  ;;  %v348_v33 = vld [vmem:[#allocation2 + $0x18] sm:$0xff] }
  0xe2   : > { %293 = vst.msk [vmem:[#allocation2 + $0x38] sm:$0xff] %vm212_vm0, %v284_v28  ;;  %v347_v38 = vld [vmem:[#allocation2 + $0x10] sm:$0xff]  ;;  %v356_v39 = vmul.f32 0.00390625, %v348_v33 }
  0xe3   : > { %292 = vst.msk [vmem:[#allocation2 + $0x30] sm:$0xff] %vm212_vm0, %v283_v30  ;;  %v355_v47 = vmul.f32 0.00390625, %v347_v38 }
  0xe5   : > { %v350_v44 = vld [vmem:[#allocation2 + $0x28] sm:$0xff] }
  0xe6   : > { %v349_v50 = vld [vmem:[#allocation2 + $0x20] sm:$0xff]  ;;  %v358_v52 = vmul.f32 0.00390625, %v350_v44 }
  0xe7   : > { %v357_v58 = vmul.f32 0.00390625, %v349_v50 }
  0xe9   : > { %v352_v57 = vld [vmem:[#allocation2 + $0x38] sm:$0xff] }
  0xea   : > { %v351_v61 = vld [vmem:[#allocation2 + $0x30] sm:$0xff]  ;;  %v360_v62 = vmul.f32 0.00390625, %v352_v57 }
  0xeb   : > { %v359_v3 = vmul.f32 0.00390625, %v351_v61 }
 0x146   : > { %v967_v34 = vpop.permute.xlu1 %966 }
 0x147   : > { %v962_v35 = vpop.permute.xlu0 %961  ;;  %v969_v40 = vunpack.i.h.bf16 %v967_v34  ;;  %v968_v41 = vunpack.i.l.bf16 %v967_v34 }
 0x148   : > { %v964_v42 = vunpack.i.h.bf16 %v962_v35  ;;  %v963_v43 = vunpack.i.l.bf16 %v962_v35 }
 0x149   : > { %v403_v55 = vsel %vm212_vm0, %v355_v47, %v968_v41  ;;  %v404_v56 = vsel %vm212_vm0, %v356_v39, %v969_v40 }
 0x14a   : > { %v401_v45 = vsel %vm212_vm0, %v353_v36, %v963_v43  ;;  %v402_v46 = vsel %vm212_vm0, %v354_v37, %v964_v42  ;;  %v889_v60 = vpack.c.bf16 %v404_v56, %v403_v55 }
 0x14b   : > { %v972_v48 = vpop.permute.xlu1 %971  ;;  %v886_v49 = vpack.c.bf16 %v402_v46, %v401_v45 }
 0x14c   : > { %v974_v53 = vunpack.i.h.bf16 %v972_v48  ;;  %v973_v54 = vunpack.i.l.bf16 %v972_v48 }
 0x14d   : > { %887 = vmatpush3.bf16.msra.mxu0 %v886_v49 }
 0x14e   : > { %888 = vmatprep.subr.bf16.mxu0 %v1099_v51  ;;  %v405_v1 = vsel %vm212_vm0, %v357_v58, %v973_v54  ;;  %v406_v2 = vsel %vm212_vm0, %v358_v52, %v974_v53 }
 0x14f   : > { %v977_v59 = vpop.permute.xlu1 %976  ;;  %v892_v4 = vpack.c.bf16 %v406_v2, %v405_v1 }
 0x150   : > { %v979_v63 = vunpack.i.h.bf16 %v977_v59  ;;  %v978_v0 = vunpack.i.l.bf16 %v977_v59 }
 0x151   : > { %890 = vmatpush3.bf16.msra.mxu0 %v889_v60 }
 0x152   : > { %891 = vmatprep.subr.bf16.mxu0 %v1099_v51  ;;  %v407_v5 = vsel %vm212_vm0, %v359_v3, %v978_v0  ;;  %v408_v6 = vsel %vm212_vm0, %v360_v62, %v979_v63 }
 0x153   : > { %v895_v7 = vpack.c.bf16 %v408_v6, %v407_v5 }
 0x155   : > { %893 = vmatpush3.bf16.msra.mxu0 %v892_v4 }
 0x156   : > { %894 = vmatprep.subr.bf16.mxu0 %v1099_v51  ;;  %v411_v51 = vld [vmem:[%s1363_s2 + $0x8] sm:$0xff] }
 0x159   : > { %896 = vmatpush3.bf16.msra.mxu0 %v895_v7 }
 0x15c   : > { %869 = vmatmul.mubr.msk.f32.vlgmr.msra.gmra.mrb[0].mxu0 %vm418_vm2, %v409_v8 }
 0x22f   : > { %v488_v10 = vpop.f32.mrb[0].mxu0 }
 0x230   : > { %v492_v11 = vmax.f32 %v488_v10, 0.0  ;;  %v870_v12 = vpop.f32.mrb[1].mxu0 }
 0x232   : > { %871 = vmatprep.subr.msk.mxu1 %vm518_vm4, %v492_v11 }
 0x233   : > { %872 = vmatpush3.msk.msra.mxu1 %vm518_vm4, %v492_v11 }
 0x234   : > { %874 = vmatmul.mubr.msk.f32.vlgmr.msra.gmra.mrb[0].mxu1 %vm493_vm3, %v411_v51 }
 0x235   : > { %876 = vmatprep.mubr.msk.f32.mxu1 %vm493_vm3, %v412_v13 }
 0x238   : > { %877 = vmatmul.mubr.msk.f32.gmra.mrb[2].mxu1 %vm493_vm3, %v413_v14 }
 0x239   : > { %879 = vmatprep.mubr.msk.f32.mxu1 %vm493_vm3, %v414_v15 }
 0x23c   : > { %880 = vmatmul.mubr.msk.f32.gmra.mrb[4].mxu1 %vm493_vm3, %v415_v16 }
 0x23d   : > { %882 = vmatprep.mubr.msk.f32.mxu1 %vm493_vm3, %v416_v17 }
 0x240   : > { %883 = vmatmul.mubr.msk.f32.gmra.mrb[6].mxu1 %vm493_vm3, %v417_v18 }
 0x307   : > { %v875_v19 = vpop.f32.mrb[0].mxu1 }
 0x308   : > { %637 = vrot.lane.b32.xlu1 %v875_v19, %s1102_s8  ;;  %v588_v20 = vpop.f32.mrb[1].mxu1 }
 0x309   : > { %635 = vrot.lane.b32.xlu0 %v588_v20, %s1102_s8 }
 0x30b   : > { %v878_v21 = vpop.f32.mrb[2].mxu1 }
 0x30c   : > { %641 = vrot.lane.b32.xlu1 %v878_v21, %s1102_s8  ;;  %v598_v22 = vpop.f32.mrb[3].mxu1 }
 0x30d   : > { %639 = vrot.lane.b32.xlu0 %v598_v22, %s1102_s8 }
 0x30f   : > { %v881_v23 = vpop.f32.mrb[4].mxu1 }
 0x310   : > { %645 = vrot.lane.b32.xlu1 %v881_v23, %s1102_s8  ;;  %v608_v24 = vpop.f32.mrb[5].mxu1 }
 0x311   : > { %643 = vrot.lane.b32.xlu0 %v608_v24, %s1102_s8 }
 0x313   : > { %v884_v25 = vpop.f32.mrb[6].mxu1 }
 0x314   : > { %649 = vrot.lane.b32.xlu1 %v884_v25, %s1102_s8  ;;  %v618_v26 = vpop.f32.mrb[7].mxu1 }
 0x315   : > { %647 = vrot.lane.b32.xlu0 %v618_v26, %s1102_s8 }
 0x37a   : > { %v638_v27 = vpop.permute.xlu1 %637 }
 0x37b   : > { %v660_v28 = vadd.f32 %v875_v19, %v638_v27  ;;  %v636_v29 = vpop.permute.xlu0 %635 }
 0x37c   : > { %v659_v30 = vadd.f32 %v636_v29, %v588_v20 }
 0x37d   : > { %v823_v31 = vmul.f32 -1.442695, %v660_v28 }
 0x37e   : > { %v822_v32 = vmul.f32 -1.442695, %v659_v30  ;;  %v642_v33 = vpop.permute.xlu1 %641 }
 0x37f   : > { %980 = vpow2.f32 %v823_v31  ;;  %v662_v34 = vadd.f32 %v878_v21, %v642_v33  ;;  %v640_v35 = vpop.permute.xlu0 %639 }
 0x380   : > { %982 = vpow2.f32 %v822_v32  ;;  %v661_v36 = vadd.f32 %v640_v35, %v598_v22 }
 0x381   : > { %v825_v37 = vmul.f32 -1.442695, %v662_v34 }
 0x382   : > { %v824_v38 = vmul.f32 -1.442695, %v661_v36  ;;  %v646_v39 = vpop.permute.xlu1 %645 }
 0x383   : > { %984 = vpow2.f32 %v825_v37  ;;  %v664_v40 = vadd.f32 %v881_v23, %v646_v39  ;;  %v644_v41 = vpop.permute.xlu0 %643 }
 0x384   : > { %986 = vpow2.f32 %v824_v38  ;;  %v663_v42 = vadd.f32 %v644_v41, %v608_v24 }
 0x385   : > { %v827_v43 = vmul.f32 -1.442695, %v664_v40 }
 0x386   : > { %v826_v44 = vmul.f32 -1.442695, %v663_v42  ;;  %v650_v45 = vpop.permute.xlu1 %649 }
 0x387   : > { %988 = vpow2.f32 %v827_v43  ;;  %v666_v46 = vadd.f32 %v884_v25, %v650_v45  ;;  %v648_v47 = vpop.permute.xlu0 %647 }
 0x388   : > { %990 = vpow2.f32 %v826_v44  ;;  %v665_v48 = vadd.f32 %v648_v47, %v618_v26 }
 0x389   : > { %v981_v49 = vpop.eup %980  ;;  %v829_v50 = vmul.f32 -1.442695, %v666_v46 }
 0x38a   : > { %v983_v52 = vpop.eup %982  ;;  %v692_v53 = vadd.f32 1.0, %v981_v49  ;;  %v828_v54 = vmul.f32 -1.442695, %v665_v48 }
 0x38b   : > { %v691_v55 = vadd.f32 1.0, %v983_v52  ;;  %992 = vpow2.f32 %v829_v50 }
 0x38c   : > { %994 = vrcp.f32 %v692_v53 }
 0x38d   : > { %v985_v56 = vpop.eup %984  ;;  %996 = vrcp.f32 %v691_v55 }
 0x38e   : > { %v987_v57 = vpop.eup %986  ;;  %v694_v58 = vadd.f32 1.0, %v985_v56  ;;  %998 = vpow2.f32 %v828_v54 }
 0x38f   : > { %v693_v59 = vadd.f32 1.0, %v987_v57 }
 0x390   : > { %1000 = vrcp.f32 %v694_v58 }
 0x391   : > { %v989_v60 = vpop.eup %988  ;;  %1002 = vrcp.f32 %v693_v59 }
 0x392   : > { %v991_v61 = vpop.eup %990  ;;  %v696_v62 = vadd.f32 1.0, %v989_v60 }
 0x393   : > { %v695_v63 = vadd.f32 1.0, %v991_v61 }
 0x394   : > { %1004 = vrcp.f32 %v696_v62 }
 0x395   : > { %v993_v0 = vpop.eup %992  ;;  %1006 = vrcp.f32 %v695_v63 }
 0x396   : > { %v995_v1 = vpop.eup %994  ;;  %v698_v2 = vadd.f32 1.0, %v993_v0 }
 0x397   : > { %v997_v3 = vpop.eup %996  ;;  %716 = vst.msk [vmem:[%s207_s6 + $0x8] sm:$0xff] %vm212_vm0, %v995_v1 }
 0x398   : > { %v999_v4 = vpop.eup %998  ;;  %715 = vst.msk [vmem:[%s207_s6] sm:$0xff] %vm212_vm0, %v997_v3  ;;  %1008 = vrcp.f32 %v698_v2 }
 0x399   : > { %v697_v5 = vadd.f32 1.0, %v999_v4 }
 0x39a   : > { %v1001_v6 = vpop.eup %1000 }
 0x39b   : > { %v1003_v7 = vpop.eup %1002  ;;  %718 = vst.msk [vmem:[%s207_s6 + $0x18] sm:$0xff] %vm212_vm0, %v1001_v6  ;;  %1010 = vrcp.f32 %v697_v5 }
 0x39c   : > { %717 = vst.msk [vmem:[%s207_s6 + $0x10] sm:$0xff] %vm212_vm0, %v1003_v7 }
 0x39e   : > { %v1005_v8 = vpop.eup %1004 }
 0x39f   : > { %v1007_v9 = vpop.eup %1006  ;;  %720 = vst.msk [vmem:[%s207_s6 + $0x28] sm:$0xff] %vm212_vm0, %v1005_v8 }
 0x3a0   : > { %719 = vst.msk [vmem:[%s207_s6 + $0x20] sm:$0xff] %vm212_vm0, %v1007_v9 }
 0x3a2   : > { %v1009_v10 = vpop.eup %1008 }
 0x3a3   : > { %722 = vst.msk [vmem:[%s207_s6 + $0x38] sm:$0xff] %vm212_vm0, %v1009_v10 }
 0x3a5   : > { %v1011_v11 = vpop.eup %1010 }
 0x3a6   : > { %721 = vst.msk [vmem:[%s207_s6 + $0x30] sm:$0xff] %vm212_vm0, %v1011_v11 }
 0x3a7 PF: > { %s16_s17 = sadd.s32 1, %s1092_s17   ;;  %s1368_s12 = smov %s1076_s13 }
 0x3a8   : > { %p13_p9 = scmp.ge.s32.totalorder %s16_s17, 4   ;;  %s1369_s13 = smov %s1080_s14 }
 0x3a9   : > { %s1370_s14 = smov %s1172_s24  ;;  %s1371_s15 = smov %s1088_s16 }
 0x3aa   : > { %s1372_s16 = smov %s1374_s19  ;;  %15 = sbr.rel (!%p13_p9) target bundleno = 4 (0x4), region = 80 }
 0x3b1   :  { %744 = vsyncpa [#allocation5], 1 }
 0x3b2   :  { %746 = vsyncpa [#allocation5 + $0x1], 1 }

</bundles_post_ra>
